<compile_context>
chip_gen: v6e
topology: v6e:2x2x1
jax: 0.10.0
libtpu: 0.0.40
codegen_flags: <defaults>
</compile_context>

<pallas_src>
import inspect

import jax
import jax.numpy as jnp
from jax.experimental import pallas as pl
from jax.experimental.pallas import tpu as pltpu


def _round_up(x, m):
    return ((x + m - 1) // m) * m


def _cdiv(a, b):
    return -(-a // b)


def _supports_buffered():
    """True if this JAX exposes pl.Buffered + BlockSpec(pipeline_mode=...)."""
    try:
        return (hasattr(pl, "Buffered")
                and "pipeline_mode" in inspect.signature(pl.BlockSpec).parameters)
    except (TypeError, ValueError):
        return False


def _choose_tiling(B, tb_max=512):
    """Pick (TB, grid_steps) so that padding is <= ~8 rows/step, TB is a multiple
    of 8 (f32 sublane), and the grid has an even number (>= 2) of steps whenever
    B > 8 (keeps both v7x TensorCores busy and the pipeline overlapped)."""
    B8 = _round_up(B, 8)
    if B8 <= 8:
        return 8, 1
    steps = max(2, _cdiv(B8, tb_max))
    if steps % 2:
        steps += 1
    TB = _round_up(_cdiv(B8, steps), 8)
    steps = _cdiv(B8, TB)          # TB rounding may have reduced the step count
    if steps % 2 and steps > 1:
        steps += 1                 # keep the v7x two-core split balanced
    return TB, steps


def _query_mlp_kernel(x_ref, w1_ref, b1_ref, w2_ref, b2_ref, w3_ref, b3_ref, o_ref):
    # Linear(256, 128) + ReLU   (bf16 MXU inputs, f32 accumulation, f32 epilogue)
    x = x_ref[...].astype(jnp.bfloat16)
    h1 = jnp.dot(x, w1_ref[...], preferred_element_type=jnp.float32)
    h1 = jnp.maximum(h1 + b1_ref[...], 0.0)
    # Linear(128, 512) + ReLU
    h2 = jnp.dot(h1.astype(jnp.bfloat16), w2_ref[...],
                 preferred_element_type=jnp.float32)
    h2 = jnp.maximum(h2 + b2_ref[...], 0.0)
    # Linear(512, 512)
    h3 = jnp.dot(h2.astype(jnp.bfloat16), w3_ref[...],
                 preferred_element_type=jnp.float32)
    o_ref[...] = (h3 + b3_ref[...]).astype(o_ref.dtype)


def query_network(query, params, *, tb_max=512, out_dtype=jnp.float32):
    """query: [B, 256] (f32 or bf16) -> [B, 4, 128] `out_dtype` (default f32,
    matching the PyTorch module; bf16 halves output HBM bytes if tolerated)."""
    w1, b1, w2, b2, w3, b3 = params
    B = query.shape[0]

    TB, G = _choose_tiling(B, tb_max)
    B_pad = TB * G
    if B_pad != B:
        query = jnp.pad(query, ((0, B_pad - B), (0, 0)))

    # Streamed query block: tiled along batch, triple-buffered where supported.
    if _supports_buffered() and G >= 2:
        q_spec = pl.BlockSpec((TB, 256), lambda i: (i, 0),
                              pipeline_mode=pl.Buffered(3))
    else:
        q_spec = pl.BlockSpec((TB, 256), lambda i: (i, 0))

    # Weights/biases: constant block index -> VMEM-resident across the whole grid.
    w_spec = lambda shape: pl.BlockSpec(shape, lambda i: (0, 0))

    in_bytes = jnp.dtype(query.dtype).itemsize
    out_bytes = jnp.dtype(out_dtype).itemsize
    mlp_flops = 256 * 128 + 128 * 512 + 512 * 512
    weight_bytes = mlp_flops * 2 + (128 + 512 + 512) * 4
    cost = pl.CostEstimate(
        flops=2 * B_pad * mlp_flops,
        transcendentals=0,
        bytes_accessed=B_pad * (256 * in_bytes + 512 * out_bytes) + weight_bytes,
    )

    out = pl.pallas_call(
        _query_mlp_kernel,
        out_shape=jax.ShapeDtypeStruct((B_pad, 512), out_dtype),
        grid_spec=pl.GridSpec(
            grid=(G,),
            in_specs=[
                q_spec,               # query  [TB, 256] streamed
                w_spec((256, 128)),   # W1 (bf16)
                w_spec((1, 128)),     # b1 (f32)
                w_spec((128, 512)),   # W2 (bf16)
                w_spec((1, 512)),     # b2 (f32)
                w_spec((512, 512)),   # W3 (bf16)
                w_spec((1, 512)),     # b3 (f32)
            ],
            # Lane-dense 512-wide output block (unmasked vst).
            out_specs=pl.BlockSpec((TB, 512), lambda i: (i, 0)),
        ),
        compiler_params=pltpu.CompilerParams(
            # Batch tiles are independent -> shard across both v7x TensorCores.
            dimension_semantics=("parallel",),
        ),
        cost_estimate=cost,
    )(query, w1, b1, w2, b2, w3, b3)

    if B_pad != B:
        out = out[:B]
    # Same as PyTorch `out.reshape(-1, 4, 128)`; kept outside the kernel so the
    # store stays lane-dense at 512 (reshape is metadata-only glue).
    return out.reshape(-1, 4, 128)


def init_params(key):
    """Deterministic synthetic params. PyTorch Linear weight is [out, in]; we store
    the transpose [in, out] (bf16) for row-major MXU matmuls; biases stay f32."""
    ks = jax.random.split(key, 6)

    def lin(kw, kb, fan_in, fan_out):
        bound = 1.0 / jnp.sqrt(fan_in)
        w = jax.random.uniform(kw, (fan_in, fan_out), jnp.float32, -bound, bound)
        b = jax.random.uniform(kb, (1, fan_out), jnp.float32, -bound, bound)
        return w.astype(jnp.bfloat16), b

    w1, b1 = lin(ks[0], ks[1], 256, 128)
    w2, b2 = lin(ks[2], ks[3], 128, 512)
    w3, b3 = lin(ks[4], ks[5], 512, 512)
    return (w1, b1, w2, b2, w3, b3)


def _reference(query, params):
    """Pure-JAX reference with the same bf16-in / f32-accumulate quantization."""
    w1, b1, w2, b2, w3, b3 = params
    x = query.astype(jnp.bfloat16)
    h = jnp.dot(x, w1, preferred_element_type=jnp.float32) + b1
    h = jnp.maximum(h, 0.0)
    h = jnp.dot(h.astype(jnp.bfloat16), w2, preferred_element_type=jnp.float32) + b2
    h = jnp.maximum(h, 0.0)
    h = jnp.dot(h.astype(jnp.bfloat16), w3, preferred_element_type=jnp.float32) + b3
    return h.reshape(-1, 4, 128)


if __name__ == "__main__":
    key = jax.random.PRNGKey(0)
    k_param, k1, k2, k3 = jax.random.split(key, 4)
    params = init_params(k_param)

    # Small batch: single grid step, TB=8.
    q_a = jax.random.normal(k1, (8, 256), jnp.float32)
    out_a = jax.block_until_ready(query_network(q_a, params))
    assert out_a.shape == (8, 4, 128), out_a.shape
    assert jnp.allclose(out_a, _reference(q_a, params), atol=2e-2, rtol=2e-2), \
        "mismatch vs reference (B=8)"

    # Ragged batch: B=300 -> TB=152, grid=(2,), only 4 padded rows.
    q_b = jax.random.normal(k2, (300, 256), jnp.float32)
    out_b = jax.block_until_ready(query_network(q_b, params))
    assert out_b.shape == (300, 4, 128), out_b.shape
    assert jnp.allclose(out_b, _reference(q_b, params), atol=2e-2, rtol=2e-2), \
        "mismatch vs reference (B=300)"

    # Larger batch: B=528 -> TB=264, grid=(2,), zero padding (previously padded to 1024).
    q_c = jax.random.normal(k3, (528, 256), jnp.float32)
    out_c = jax.block_until_ready(query_network(q_c, params))
    assert out_c.shape == (528, 4, 128), out_c.shape
    assert jnp.allclose(out_c, _reference(q_c, params), atol=2e-2, rtol=2e-2), \
        "mismatch vs reference (B=528)"

    # bf16-output fast path (halves output HBM bytes); sanity-check shape/dtype.
    out_d = jax.block_until_ready(query_network(q_c, params, out_dtype=jnp.bfloat16))
    assert out_d.shape == (528, 4, 128) and out_d.dtype == jnp.bfloat16
    assert bool(jnp.all(jnp.isfinite(out_d.astype(jnp.float32))))

    print("KERNEL_OK")
</pallas_src>

<mosaic_0001>
module attributes {stable_mosaic.version = 11 : i64} {
  func.func @_query_mlp_kernel(%arg0: i32, %arg1: memref<8x256xf32, #tpu.memory_space<vmem>>, %arg2: memref<256x128xbf16, #tpu.memory_space<vmem>>, %arg3: memref<1x128xf32, #tpu.memory_space<vmem>>, %arg4: memref<128x512xbf16, #tpu.memory_space<vmem>>, %arg5: memref<1x512xf32, #tpu.memory_space<vmem>>, %arg6: memref<512x512xbf16, #tpu.memory_space<vmem>>, %arg7: memref<1x512xf32, #tpu.memory_space<vmem>>, %arg8: memref<8x512xf32, #tpu.memory_space<vmem>>) attributes {dimension_semantics = [#tpu.dimension_semantics<parallel>], iteration_bounds = array<i64: 1>, scalar_prefetch = 0 : i64, scratch_operands = 0 : i64, tpu.core_type = #tpu.core_type<tc>, window_params = [{transform_indices = @transform_0, window_bounds = array<i64: 8, 256>}, {pipeline_mode = #tpu.pipeline_mode<synchronous>, transform_indices = @transform_1, window_bounds = array<i64: 256, 128>}, {pipeline_mode = #tpu.pipeline_mode<synchronous>, transform_indices = @transform_2, window_bounds = array<i64: 1, 128>}, {pipeline_mode = #tpu.pipeline_mode<synchronous>, transform_indices = @transform_3, window_bounds = array<i64: 128, 512>}, {pipeline_mode = #tpu.pipeline_mode<synchronous>, transform_indices = @transform_4, window_bounds = array<i64: 1, 512>}, {pipeline_mode = #tpu.pipeline_mode<synchronous>, transform_indices = @transform_5, window_bounds = array<i64: 512, 512>}, {pipeline_mode = #tpu.pipeline_mode<synchronous>, transform_indices = @transform_6, window_bounds = array<i64: 1, 512>}, {transform_indices = @transform_7, window_bounds = array<i64: 8, 512>}]} {
    %c0 = arith.constant 0 : index
    %c0_0 = arith.constant 0 : index
    %0 = vector.load %arg1[%c0, %c0_0] : memref<8x256xf32, #tpu.memory_space<vmem>>, vector<8x256xf32>
    %1 = arith.truncf %0 : vector<8x256xf32> to vector<8x256xbf16>
    %c0_1 = arith.constant 0 : index
    %c0_2 = arith.constant 0 : index
    %2 = vector.load %arg2[%c0_1, %c0_2] : memref<256x128xbf16, #tpu.memory_space<vmem>>, vector<256x128xbf16>
    %cst = arith.constant dense<0.000000e+00> : vector<8x128xf32>
    %3 = tpu.matmul %1, %2, %cst {dimension_numbers = #tpu.dot_dimension_numbers<[1], [0], [0], [1], [0, 0, 1, 1], [], []>} : vector<8x256xbf16>, vector<256x128xbf16>, vector<8x128xf32> -> vector<8x128xf32>
    %c0_3 = arith.constant 0 : index
    %c0_4 = arith.constant 0 : index
    %4 = vector.load %arg3[%c0_3, %c0_4] : memref<1x128xf32, #tpu.memory_space<vmem>>, vector<1x128xf32>
    %5 = vector.broadcast %4 : vector<1x128xf32> to vector<8x128xf32>
    %6 = arith.addf %3, %5 : vector<8x128xf32>
    %cst_5 = arith.constant 0.000000e+00 : f32
    %7 = vector.broadcast %cst_5 : f32 to vector<8x128xf32>
    %8 = arith.maximumf %6, %7 : vector<8x128xf32>
    %9 = arith.truncf %8 : vector<8x128xf32> to vector<8x128xbf16>
    %c0_6 = arith.constant 0 : index
    %c0_7 = arith.constant 0 : index
    %10 = vector.load %arg4[%c0_6, %c0_7] : memref<128x512xbf16, #tpu.memory_space<vmem>>, vector<128x512xbf16>
    %cst_8 = arith.constant dense<0.000000e+00> : vector<8x512xf32>
    %11 = tpu.matmul %9, %10, %cst_8 {dimension_numbers = #tpu.dot_dimension_numbers<[1], [0], [0], [1], [0, 0, 1, 1], [], []>} : vector<8x128xbf16>, vector<128x512xbf16>, vector<8x512xf32> -> vector<8x512xf32>
    %c0_9 = arith.constant 0 : index
    %c0_10 = arith.constant 0 : index
    %12 = vector.load %arg5[%c0_9, %c0_10] : memref<1x512xf32, #tpu.memory_space<vmem>>, vector<1x512xf32>
    %13 = vector.broadcast %12 : vector<1x512xf32> to vector<8x512xf32>
    %14 = arith.addf %11, %13 : vector<8x512xf32>
    %cst_11 = arith.constant 0.000000e+00 : f32
    %15 = vector.broadcast %cst_11 : f32 to vector<8x512xf32>
    %16 = arith.maximumf %14, %15 : vector<8x512xf32>
    %17 = arith.truncf %16 : vector<8x512xf32> to vector<8x512xbf16>
    %c0_12 = arith.constant 0 : index
    %c0_13 = arith.constant 0 : index
    %18 = vector.load %arg6[%c0_12, %c0_13] : memref<512x512xbf16, #tpu.memory_space<vmem>>, vector<512x512xbf16>
    %cst_14 = arith.constant dense<0.000000e+00> : vector<8x512xf32>
    %19 = tpu.matmul %17, %18, %cst_14 {dimension_numbers = #tpu.dot_dimension_numbers<[1], [0], [0], [1], [0, 0, 1, 1], [], []>} : vector<8x512xbf16>, vector<512x512xbf16>, vector<8x512xf32> -> vector<8x512xf32>
    %c0_15 = arith.constant 0 : index
    %c0_16 = arith.constant 0 : index
    %20 = vector.load %arg7[%c0_15, %c0_16] : memref<1x512xf32, #tpu.memory_space<vmem>>, vector<1x512xf32>
    %21 = vector.broadcast %20 : vector<1x512xf32> to vector<8x512xf32>
    %22 = arith.addf %19, %21 : vector<8x512xf32>
    %c0_17 = arith.constant 0 : index
    %c0_18 = arith.constant 0 : index
    %23 = vector.load %arg8[%c0_17, %c0_18] : memref<8x512xf32, #tpu.memory_space<vmem>>, vector<8x512xf32>
    tpu.vector_store %arg8[%c0_17, %c0_18], %22 {strides = array<i32>} : memref<8x512xf32, #tpu.memory_space<vmem>>, vector<8x512xf32>,
    return
  }
  func.func @transform_0(%arg0: i32) -> (i32, i32) {
    %c0_i32 = arith.constant 0 : i32
    %c0_i32_0 = arith.constant 0 : i32
    return %arg0, %c0_i32 : i32, i32
  }
  func.func @transform_1(%arg0: i32) -> (i32, i32) {
    %c0_i32 = arith.constant 0 : i32
    %c0_i32_0 = arith.constant 0 : i32
    %c0_i32_1 = arith.constant 0 : i32
    return %c0_i32, %c0_i32_0 : i32, i32
  }
  func.func @transform_2(%arg0: i32) -> (i32, i32) {
    %c0_i32 = arith.constant 0 : i32
    %c0_i32_0 = arith.constant 0 : i32
    %c0_i32_1 = arith.constant 0 : i32
    return %c0_i32, %c0_i32_0 : i32, i32
  }
  func.func @transform_3(%arg0: i32) -> (i32, i32) {
    %c0_i32 = arith.constant 0 : i32
    %c0_i32_0 = arith.constant 0 : i32
    %c0_i32_1 = arith.constant 0 : i32
    return %c0_i32, %c0_i32_0 : i32, i32
  }
  func.func @transform_4(%arg0: i32) -> (i32, i32) {
    %c0_i32 = arith.constant 0 : i32
    %c0_i32_0 = arith.constant 0 : i32
    %c0_i32_1 = arith.constant 0 : i32
    return %c0_i32, %c0_i32_0 : i32, i32
  }
  func.func @transform_5(%arg0: i32) -> (i32, i32) {
    %c0_i32 = arith.constant 0 : i32
    %c0_i32_0 = arith.constant 0 : i32
    %c0_i32_1 = arith.constant 0 : i32
    return %c0_i32, %c0_i32_0 : i32, i32
  }
  func.func @transform_6(%arg0: i32) -> (i32, i32) {
    %c0_i32 = arith.constant 0 : i32
    %c0_i32_0 = arith.constant 0 : i32
    %c0_i32_1 = arith.constant 0 : i32
    return %c0_i32, %c0_i32_0 : i32, i32
  }
  func.func @transform_7(%arg0: i32) -> (i32, i32) {
    %c0_i32 = arith.constant 0 : i32
    %c0_i32_0 = arith.constant 0 : i32
    return %arg0, %c0_i32 : i32, i32
  }
}

</mosaic_0001>

<bundles_post_ra>
// kernel: tpu_custom_call.1
= control target key start
LH: loop header
LB: loop body
LE: loop exit
PB: predicated region body
PF: predicated region fallthrough
CT: control target
= control target key end

     0   :  { %12 = vsyncpa [#allocation3], 0  ;;  %s2218_s0 = inlined_call_operand.hbm [shape: f32[8,256], index: 0, kind: input, shape index: {}]   ;;  %s2219_s1 = inlined_call_operand.hbm [shape: bf16[256,128], index: 1, kind: input, shape index: {}]   ;;  %s2220_s2 = inlined_call_operand.vmem [shape: f32[1,128], index: 2, kind: input, shape index: {}]   ;;  %s2221_s3 = inlined_call_operand.hbm [shape: bf16[128,512], index: 3, kind: input, shape index: {}]   ;;  %s2222_s4 = inlined_call_operand.vmem [shape: f32[1,512], index: 4, kind: input, shape index: {}]   ;;  %s2223_s5 = inlined_call_operand.hbm [shape: bf16[512,512], index: 5, kind: input, shape index: {}]   ;;  %s2224_s6 = inlined_call_operand.vmem [shape: f32[1,512], index: 6, kind: input, shape index: {}]   ;;  %s2225_s7 = inlined_call_operand.hbm [shape: f32[8,512], index: 7, kind: output, shape index: {}]  }
   0x1   :  { %13 = vsyncpa [#allocation6], 0 }
   0x2   :  { %14 = vsyncpa [#allocation9], 0 }
   0x3   :  { %15 = vsyncpa [#allocation4], 0  ;;  %s2114_s24 = smov [#allocation5]  }
   0x4   :  { %s31_s25 = sshll.u32 %s2114_s24, 4  ;;  %s32_s25 = int_to_ptr.vmem [resolvable:$true] %s31_s25 }
   0x5   :  { %s2014_s26 = scalar_lea.vmem %s32_s25, 2048  ;;  %p2019_p1 = scmp.lt.s32.totalorder %s32_s25, %s32_s25 }
   0x6   :  { %p2015_p0 = scmp.ne.s32.totalorder %s32_s25, %s2014_s26  ;;  %p2020_p2 = scmp.lt.s32.totalorder %s2014_s26, %s2014_s26 }
   0x8   :  { %p2021_p3 = por %p2020_p2, %p2019_p1 }
   0xa   :  { %p2022_p4 = pnand %p2021_p3, %p2015_p0 }
   0xc   :  { %2025 = shalt.err (!%p2022_p4)
}
   0xd   :  { %s2115_s27 = smov 64   ;;  %s2116_s28 = smov 4  }
   0xe   :  { %37 = dma.hbm_to_vmem [thread:$0]  %s2219_s1, 2048, %s32_s25, [#allocation6], %s2115_s27, %s2115_s27, %s2116_s28  }
   0xf   :  { %s2117_s8 = smov [#allocation2]   ;;  %s2118_s10 = smov [#allocation7]  }
  0x10   :  { %s22_s9 = sshll.u32 %s2117_s8, 4  ;;  %s45_s11 = sshll.u32 %s2118_s10, 4  ;;  %s23_s9 = int_to_ptr.vmem [resolvable:$true] %s22_s9  ;;  %s46_s11 = int_to_ptr.vmem [resolvable:$true] %s45_s11 }
  0x11   :  { %s2034_s12 = scalar_lea.vmem %s23_s9, 256  ;;  %p2039_p6 = scmp.lt.s32.totalorder %s23_s9, %s23_s9 }
  0x12   :  { %p2035_p5 = scmp.ne.s32.totalorder %s23_s9, %s2034_s12  ;;  %p2040_p7 = scmp.lt.s32.totalorder %s2034_s12, %s2034_s12 }
  0x14   :  { %p2041_p8 = por %p2040_p7, %p2039_p6 }
  0x16   :  { %p2042_p9 = pnand %p2041_p8, %p2035_p5 }
  0x18   :  { %2045 = shalt.err (!%p2042_p9)
}
  0x19   :  { %25 = dma.hbm_to_vmem [thread:$0]  %s2218_s0, 256, %s23_s9, [#allocation3]  }
  0x1a   :  { %s2054_s15 = scalar_lea.vmem %s46_s11, 4096  ;;  %p2059_p11 = scmp.lt.s32.totalorder %s46_s11, %s46_s11 }
  0x1b   :  { %p2055_p10 = scmp.ne.s32.totalorder %s46_s11, %s2054_s15  ;;  %p2060_p12 = scmp.lt.s32.totalorder %s2054_s15, %s2054_s15 }
  0x1d   :  { %p2061_p13 = por %p2060_p12, %p2059_p11 }
  0x1f   :  { %p2062_p0 = pnand %p2061_p13, %p2055_p10 }
  0x21   :  { %2065 = shalt.err (!%p2062_p0)
}
  0x22   :  { %s2119_s1 = smov 256   ;;  %s2120_s16 = smov 16  }
  0x23   :  { %51 = dma.hbm_to_vmem [thread:$0]  %s2221_s3, 4096, %s46_s11, [#allocation6], %s2119_s1, %s2119_s1, %s2120_s16  }
  0x24   :  { %s2121_s19 = smov [#allocation8]  }
  0x25   :  { %s59_s20 = sshll.u32 %s2121_s19, 4  ;;  %s60_s20 = int_to_ptr.vmem [resolvable:$true] %s59_s20 }
  0x26   :  { %s2074_s21 = scalar_lea.vmem %s60_s20, 16384  ;;  %p2079_p2 = scmp.lt.s32.totalorder %s60_s20, %s60_s20 }
  0x27   :  { %p2075_p1 = scmp.ne.s32.totalorder %s60_s20, %s2074_s21  ;;  %p2080_p3 = scmp.lt.s32.totalorder %s2074_s21, %s2074_s21 }
  0x29   :  { %p2081_p4 = por %p2080_p3, %p2079_p2 }
  0x2b   :  { %p2082_p5 = pnand %p2081_p4, %p2075_p1 }
  0x2d   :  { %2085 = shalt.err (!%p2082_p5)
}
  0x2e   :  { %65 = dma.hbm_to_vmem [thread:$0]  %s2223_s5, 16384, %s60_s20, [#allocation9], %s2119_s1, %s2119_s1, %s2120_s16  }
  0x2f   :  { %2106 = dma.done.wait [#allocation3], 256  }
  0x30   :  { %2107 = vsyncadd [#allocation3], 4294967040 }
  0x31   :  { %2108 = dma.done.wait [#allocation6], 6144  }
  0x32   :  { %2109 = vsyncadd [#allocation6], 4294961152 }
  0x33   :  { %2110 = dma.done.wait [#allocation9], 16384  }
  0x34   :  { %2111 = vsyncadd [#allocation9], 4294950912  ;;  %v1750_v0 = vld [vmem:[#allocation5 + $0x78] sm:$0xff]   ;;  %v1752_v2 = vld [vmem:[#allocation5 + $0x70] sm:$0xff]   ;;  %v2122_v52 = vmov 0  }
  0x35   :  { %v1751_v1 = vld [vmem:[#allocation5 + $0x38] sm:$0xff]   ;;  %1718 = vmatprep.subr.bf16.mxu0 %v1750_v0  ;;  %v1753_v3 = vld [vmem:[#allocation5 + $0x30] sm:$0xff]   ;;  %v1754_v4 = vld [vmem:[#allocation5 + $0x68] sm:$0xff]   ;;  %508 = vmatprep.mubr.bf16.mxu1 %v2122_v52 }
  0x36   :  { %1719 = vmatpush3.bf16.msra.mxu0 %v1751_v1  ;;  %v1755_v5 = vld [vmem:[#allocation5 + $0x28] sm:$0xff]   ;;  %v1756_v6 = vld [vmem:[#allocation5 + $0x60] sm:$0xff]   ;;  %v1758_v8 = vld [vmem:[#allocation5 + $0x58] sm:$0xff]  }
  0x37   :  { %1720 = vmatprep.subr.bf16.mxu0 %v1752_v2  ;;  %v1757_v7 = vld [vmem:[#allocation5 + $0x20] sm:$0xff]   ;;  %v1759_v9 = vld [vmem:[#allocation5 + $0x18] sm:$0xff]   ;;  %v1760_v10 = vld [vmem:[#allocation5 + $0x50] sm:$0xff]  }
  0x38   :  { %v82_v11 = vld [vmem:[#allocation2 + $0x8] sm:$0xff]  ;;  %v1766_v13 = vld [vmem:[#allocation7 + $0xe4] ss:$16 sps:$4 sm:$0xff]   ;;  %v1762_v15 = vld [vmem:[#allocation5 + $0x48] sm:$0xff]  }
  0x39   :  { %v84_v12 = vpack.c.bf16 %v82_v11, %v82_v11  ;;  %v1761_v14 = vld [vmem:[#allocation5 + $0x10] sm:$0xff]   ;;  %476 = vmatprep.subr.bf16.mxu1 %v1766_v13  ;;  %v1763_v20 = vld [vmem:[#allocation5 + $0x8] sm:$0xff]   ;;  %v1764_v21 = vld [vmem:[#allocation5 + $0x40] sm:$0xff]  }
  0x3a   :  { %1721 = vmatpush3.bf16.msra.mxu0 %v1753_v3  ;;  %v1771_v16 = vld [vmem:[#allocation7 + $0xe0] ss:$16 sps:$4 sm:$0xff]   ;;  %v1772_v17 = vld [vmem:[#allocation7 + $0xc4] ss:$16 sps:$4 sm:$0xff]   ;;  %v1770_v26 = vld [vmem:[#allocation7 + $0xec] ss:$16 sps:$4 sm:$0xff]  }
  0x3b   :  { %1722 = vmatprep.subr.bf16.mxu0 %v1754_v4  ;;  %252 = vmatprep.mubr.bf16.mxu0 %v84_v12  ;;  %v1777_v18 = vld [vmem:[#allocation7 + $0xc0] ss:$16 sps:$4 sm:$0xff]   ;;  %v1778_v19 = vld [vmem:[#allocation7 + $0xa4] ss:$16 sps:$4 sm:$0xff]   ;;  %v1768_v27 = vld [vmem:[#allocation7 + $0xe8] ss:$16 sps:$4 sm:$0xff]  }
  0x3c   :  { %477 = vmatpush1.bf16.msra.mxu1 %v1771_v16  ;;  %v1783_v22 = vld [vmem:[#allocation7 + $0xa0] ss:$16 sps:$4 sm:$0xff]   ;;  %v1784_v24 = vld [vmem:[#allocation7 + $0x84] ss:$16 sps:$4 sm:$0xff]   ;;  %v1776_v30 = vld [vmem:[#allocation7 + $0xcc] ss:$16 sps:$4 sm:$0xff]  }
  0x3d   :  { %478 = vmatprep.subr.bf16.mxu1 %v1772_v17  ;;  %v1765_v23 = vld [vmem:[#allocation5] sm:$0xff]   ;;  %v81_v25 = vld [vmem:[#allocation2] sm:$0xff]  ;;  %v1774_v34 = vld [vmem:[#allocation7 + $0xc8] ss:$16 sps:$4 sm:$0xff]  }
  0x3e   :  { %1723 = vmatpush3.bf16.msra.mxu0 %v1755_v5  ;;  %v1789_v28 = vld [vmem:[#allocation7 + $0x80] ss:$16 sps:$4 sm:$0xff]   ;;  %v83_v29 = vpack.c.bf16 %v81_v25, %v81_v25  ;;  %v1790_v31 = vld [vmem:[#allocation7 + $0x64] ss:$16 sps:$4 sm:$0xff]   ;;  %v1782_v35 = vld [vmem:[#allocation7 + $0xac] ss:$16 sps:$4 sm:$0xff]  }
  0x3f   :  { %1724 = vmatprep.subr.bf16.mxu0 %v1756_v6  ;;  %v1795_v32 = vld [vmem:[#allocation7 + $0x60] ss:$16 sps:$4 sm:$0xff]   ;;  %v1796_v33 = vld [vmem:[#allocation7 + $0x44] ss:$16 sps:$4 sm:$0xff]   ;;  %v1780_v36 = vld [vmem:[#allocation7 + $0xa8] ss:$16 sps:$4 sm:$0xff]  }
  0x40   :  { %479 = vmatpush1.bf16.msra.mxu1 %v1777_v18  ;;  %v1788_v37 = vld [vmem:[#allocation7 + $0x8c] ss:$16 sps:$4 sm:$0xff]   ;;  %v1786_v38 = vld [vmem:[#allocation7 + $0x88] ss:$16 sps:$4 sm:$0xff]   ;;  %v1801_v43 = vld [vmem:[#allocation7 + $0x40] ss:$16 sps:$4 sm:$0xff]  }
  0x41   :  { %480 = vmatprep.subr.bf16.mxu1 %v1778_v19  ;;  %v1794_v39 = vld [vmem:[#allocation7 + $0x6c] ss:$16 sps:$4 sm:$0xff]   ;;  %v1792_v40 = vld [vmem:[#allocation7 + $0x68] ss:$16 sps:$4 sm:$0xff]   ;;  %v1802_v44 = vld [vmem:[#allocation7 + $0x24] ss:$16 sps:$4 sm:$0xff]  }
  0x42   :  { %1725 = vmatpush3.bf16.msra.mxu0 %v1757_v7  ;;  %v1800_v41 = vld [vmem:[#allocation7 + $0x4c] ss:$16 sps:$4 sm:$0xff]   ;;  %v1798_v42 = vld [vmem:[#allocation7 + $0x48] ss:$16 sps:$4 sm:$0xff]   ;;  %v1807_v47 = vld [vmem:[#allocation7 + $0x20] ss:$16 sps:$4 sm:$0xff]  }
  0x43   :  { %1726 = vmatprep.subr.bf16.mxu0 %v1758_v8  ;;  %v1806_v45 = vld [vmem:[#allocation7 + $0x2c] ss:$16 sps:$4 sm:$0xff]   ;;  %v1804_v46 = vld [vmem:[#allocation7 + $0x28] ss:$16 sps:$4 sm:$0xff]   ;;  %v1808_v48 = vld [vmem:[#allocation7 + $0x4] ss:$16 sps:$4 sm:$0xff]  }
  0x44   :  { %481 = vmatpush1.bf16.msra.mxu1 %v1783_v22  ;;  %v1812_v49 = vld [vmem:[#allocation7 + $0xc] ss:$16 sps:$4 sm:$0xff]   ;;  %v1810_v50 = vld [vmem:[#allocation7 + $0x8] ss:$16 sps:$4 sm:$0xff]   ;;  %v1813_v51 = vld [vmem:[#allocation7] ss:$16 sps:$4 sm:$0xff]  }
  0x45   :  { %482 = vmatprep.subr.bf16.mxu1 %v1784_v24  ;;  %v1816_v53 = vld [vmem:[#allocation8 + $0xe4] ss:$16 sps:$4 sm:$0xff]   ;;  %v1541_v56 = vld [vmem:[%s2220_s2] ss:$0 sm:$0xff] }
  0x46   :  { %1727 = vmatpush3.bf16.msra.mxu0 %v1759_v9  ;;  %v1819_v54 = vld [vmem:[#allocation8 + $0x2e4] ss:$16 sps:$4 sm:$0xff]   ;;  %v1814_v63 = vld [vmem:[#allocation8 + $0xe0] ss:$16 sps:$4 sm:$0xff]  }
  0x47   :  { %1728 = vmatprep.subr.bf16.mxu0 %v1760_v10  ;;  %v1817_v0 = vld [vmem:[#allocation8 + $0x2e0] ss:$16 sps:$4 sm:$0xff]   ;;  %v1822_v2 = vld [vmem:[#allocation8 + $0xc4] ss:$16 sps:$4 sm:$0xff]  }
  0x48   :  { %483 = vmatpush1.bf16.msra.mxu1 %v1789_v28  ;;  %v1825_v3 = vld [vmem:[#allocation8 + $0x2c4] ss:$16 sps:$4 sm:$0xff]   ;;  %v1820_v4 = vld [vmem:[#allocation8 + $0xc0] ss:$16 sps:$4 sm:$0xff]  }
  0x49   :  { %484 = vmatprep.subr.bf16.mxu1 %v1790_v31  ;;  %v1823_v5 = vld [vmem:[#allocation8 + $0x2c0] ss:$16 sps:$4 sm:$0xff]   ;;  %v1828_v6 = vld [vmem:[#allocation8 + $0xa4] ss:$16 sps:$4 sm:$0xff]  }
  0x4a   :  { %1729 = vmatpush3.bf16.msra.mxu0 %v1761_v14  ;;  %v1831_v7 = vld [vmem:[#allocation8 + $0x2a4] ss:$16 sps:$4 sm:$0xff]   ;;  %v1826_v8 = vld [vmem:[#allocation8 + $0xa0] ss:$16 sps:$4 sm:$0xff]  }
  0x4b   :  { %1730 = vmatprep.subr.bf16.mxu0 %v1762_v15  ;;  %v1829_v9 = vld [vmem:[#allocation8 + $0x2a0] ss:$16 sps:$4 sm:$0xff]   ;;  %v1834_v10 = vld [vmem:[#allocation8 + $0x84] ss:$16 sps:$4 sm:$0xff]  }
  0x4c   :  { %485 = vmatpush1.bf16.msra.mxu1 %v1795_v32  ;;  %v1837_v11 = vld [vmem:[#allocation8 + $0x284] ss:$16 sps:$4 sm:$0xff]   ;;  %v1832_v12 = vld [vmem:[#allocation8 + $0x80] ss:$16 sps:$4 sm:$0xff]  }
  0x4d   :  { %486 = vmatprep.subr.bf16.mxu1 %v1796_v33  ;;  %v1835_v13 = vld [vmem:[#allocation8 + $0x280] ss:$16 sps:$4 sm:$0xff]   ;;  %v1840_v14 = vld [vmem:[#allocation8 + $0x64] ss:$16 sps:$4 sm:$0xff]  }
  0x4e   :  { %1731 = vmatpush3.bf16.msra.mxu0 %v1763_v20  ;;  %v1843_v15 = vld [vmem:[#allocation8 + $0x264] ss:$16 sps:$4 sm:$0xff]   ;;  %v1838_v16 = vld [vmem:[#allocation8 + $0x60] ss:$16 sps:$4 sm:$0xff]  }
  0x4f   :  { %1732 = vmatprep.subr.bf16.mxu0 %v1764_v21  ;;  %v1841_v17 = vld [vmem:[#allocation8 + $0x260] ss:$16 sps:$4 sm:$0xff]   ;;  %v1846_v18 = vld [vmem:[#allocation8 + $0x44] ss:$16 sps:$4 sm:$0xff]  }
  0x50   :  { %487 = vmatpush1.bf16.msra.mxu1 %v1801_v43  ;;  %v1849_v19 = vld [vmem:[#allocation8 + $0x244] ss:$16 sps:$4 sm:$0xff]   ;;  %v1844_v20 = vld [vmem:[#allocation8 + $0x40] ss:$16 sps:$4 sm:$0xff]  }
  0x51   :  { %488 = vmatprep.subr.bf16.mxu1 %v1802_v44  ;;  %v1847_v21 = vld [vmem:[#allocation8 + $0x240] ss:$16 sps:$4 sm:$0xff]   ;;  %v1852_v22 = vld [vmem:[#allocation8 + $0x24] ss:$16 sps:$4 sm:$0xff]  }
  0x52   :  { %1733 = vmatpush3.bf16.msra.mxu0 %v1765_v23  ;;  %v1855_v23 = vld [vmem:[#allocation8 + $0x224] ss:$16 sps:$4 sm:$0xff]   ;;  %v1850_v24 = vld [vmem:[#allocation8 + $0x20] ss:$16 sps:$4 sm:$0xff]  }
  0x53   :  { %517 = vmatprep.subr.bf16.mxu0 %v1770_v26  ;;  %v1853_v25 = vld [vmem:[#allocation8 + $0x220] ss:$16 sps:$4 sm:$0xff]   ;;  %v1858_v26 = vld [vmem:[#allocation8 + $0x4] ss:$16 sps:$4 sm:$0xff]  }
  0x54   :  { %489 = vmatpush1.bf16.msra.mxu1 %v1807_v47  ;;  %v1856_v28 = vld [vmem:[#allocation8] ss:$16 sps:$4 sm:$0xff]   ;;  %v1867_v31 = vld [vmem:[#allocation8 + $0x3e4] ss:$16 sps:$4 sm:$0xff]  }
  0x55   :  { %253 = vmatmul.mubr.bf16.vlgmr.msra.gmra.mxu0 %v83_v29  ;;  %490 = vmatprep.subr.bf16.mxu1 %v1808_v48  ;;  %v1859_v29 = vld [vmem:[#allocation8 + $0x200] ss:$16 sps:$4 sm:$0xff]   ;;  %v1885_v43 = vld [vmem:[#allocation8 + $0x384] ss:$16 sps:$4 sm:$0xff]  }
  0x56   :  { %518 = vmatpush1.bf16.msra.mxu0 %v1768_v27  ;;  %549 = vmatprep.mubr.bf16.mxu0 %v2122_v52  ;;  %v1861_v27 = vld [vmem:[#allocation8 + $0x204] ss:$16 sps:$4 sm:$0xff]   ;;  %v1862_v32 = vld [vmem:[#allocation8 + $0x1e0] ss:$16 sps:$4 sm:$0xff]  }
  0x57   :  { %519 = vmatprep.subr.bf16.mxu0 %v1776_v30  ;;  %v1864_v30 = vld [vmem:[#allocation8 + $0x1e4] ss:$16 sps:$4 sm:$0xff]   ;;  %v1865_v33 = vld [vmem:[#allocation8 + $0x3e0] ss:$16 sps:$4 sm:$0xff]  }
  0x58   :  { %491 = vmatpush1.bf16.msra.mxu1 %v1813_v51  ;;  %v1880_v44 = vld [vmem:[#allocation8 + $0x180] ss:$16 sps:$4 sm:$0xff]   ;;  %v1891_v47 = vld [vmem:[#allocation8 + $0x364] ss:$16 sps:$4 sm:$0xff]  }
  0x59   :  { %1356 = vmatprep.subr.bf16.mxu1 %v1816_v53  ;;  %v1886_v48 = vld [vmem:[#allocation8 + $0x160] ss:$16 sps:$4 sm:$0xff]   ;;  %v1897_v51 = vld [vmem:[#allocation8 + $0x344] ss:$16 sps:$4 sm:$0xff]  }
  0x5a   :  { %520 = vmatpush1.bf16.msra.mxu0 %v1774_v34  ;;  %v1870_v34 = vld [vmem:[#allocation8 + $0x1c4] ss:$16 sps:$4 sm:$0xff]   ;;  %v1892_v52 = vld [vmem:[#allocation8 + $0x140] ss:$16 sps:$4 sm:$0xff]  }
  0x5b   :  { %521 = vmatprep.subr.bf16.mxu0 %v1782_v35  ;;  %v1873_v35 = vld [vmem:[#allocation8 + $0x3c4] ss:$16 sps:$4 sm:$0xff]   ;;  %v1895_v53 = vld [vmem:[#allocation8 + $0x340] ss:$16 sps:$4 sm:$0xff]  }
  0x5e   :  { %522 = vmatpush1.bf16.msra.mxu0 %v1780_v36  ;;  %v1868_v36 = vld [vmem:[#allocation8 + $0x1c0] ss:$16 sps:$4 sm:$0xff]  }
  0x5f   :  { %523 = vmatprep.subr.bf16.mxu0 %v1788_v37  ;;  %v1871_v37 = vld [vmem:[#allocation8 + $0x3c0] ss:$16 sps:$4 sm:$0xff]  }
  0x62   :  { %524 = vmatpush1.bf16.msra.mxu0 %v1786_v38  ;;  %v1876_v38 = vld [vmem:[#allocation8 + $0x1a4] ss:$16 sps:$4 sm:$0xff]  }
  0x63   :  { %525 = vmatprep.subr.bf16.mxu0 %v1794_v39  ;;  %v1879_v39 = vld [vmem:[#allocation8 + $0x3a4] ss:$16 sps:$4 sm:$0xff]  }
  0x66   :  { %526 = vmatpush1.bf16.msra.mxu0 %v1792_v40  ;;  %v1874_v40 = vld [vmem:[#allocation8 + $0x1a0] ss:$16 sps:$4 sm:$0xff]  }
  0x67   :  { %527 = vmatprep.subr.bf16.mxu0 %v1800_v41  ;;  %v1877_v41 = vld [vmem:[#allocation8 + $0x3a0] ss:$16 sps:$4 sm:$0xff]  }
  0x6a   :  { %528 = vmatpush1.bf16.msra.mxu0 %v1798_v42  ;;  %v1882_v42 = vld [vmem:[#allocation8 + $0x184] ss:$16 sps:$4 sm:$0xff]  }
  0x6b   :  { %529 = vmatprep.subr.bf16.mxu0 %v1806_v45  ;;  %v1883_v45 = vld [vmem:[#allocation8 + $0x380] ss:$16 sps:$4 sm:$0xff]  }
  0x6e   :  { %530 = vmatpush1.bf16.msra.mxu0 %v1804_v46  ;;  %v1888_v46 = vld [vmem:[#allocation8 + $0x164] ss:$16 sps:$4 sm:$0xff]  }
  0x6f   :  { %531 = vmatprep.subr.bf16.mxu0 %v1812_v49  ;;  %v1889_v49 = vld [vmem:[#allocation8 + $0x360] ss:$16 sps:$4 sm:$0xff]  }
  0x72   :  { %532 = vmatpush1.bf16.msra.mxu0 %v1810_v50  ;;  %v1894_v50 = vld [vmem:[#allocation8 + $0x144] ss:$16 sps:$4 sm:$0xff]  }
  0x73   :  { %1397 = vmatprep.subr.bf16.mxu0 %v1819_v54  ;;  %v1900_v54 = vld [vmem:[#allocation8 + $0x124] ss:$16 sps:$4 sm:$0xff]  }
 0x115   :  { %v1734_v55 = vpop.f32.mrf.mxu0 }
 0x117   :  { %v1735_v57 = vpop.f32.mrf.mxu0 }
 0x118   :  { %v1736_v58 = vadd.f32 %v1735_v57, %v1734_v55  ;;  %v1903_v55 = vld [vmem:[#allocation8 + $0x324] ss:$16 sps:$4 sm:$0xff]   ;;  %v1901_v57 = vld [vmem:[#allocation8 + $0x320] ss:$16 sps:$4 sm:$0xff]  }
 0x119   :  { %v1737_v59 = vpop.f32.mrf.mxu0 }
 0x11a   :  { %v255_v60 = vadd.f32 %v1736_v58, %v1541_v56  ;;  %v1898_v56 = vld [vmem:[#allocation8 + $0x120] ss:$16 sps:$4 sm:$0xff]   ;;  %v1906_v58 = vld [vmem:[#allocation8 + $0x104] ss:$16 sps:$4 sm:$0xff]  }
 0x11b   :  { %v1738_v61 = vpop.f32.mrf.mxu0  ;;  %v1909_v59 = vld [vmem:[#allocation8 + $0x304] ss:$16 sps:$4 sm:$0xff]  }
 0x11c   :  { %v260_v62 = vmax.f32 %v255_v60, 0.0  ;;  %v1904_v60 = vld [vmem:[#allocation8 + $0x100] ss:$16 sps:$4 sm:$0xff]  }
 0x11d   :  { %v1907_v61 = vld [vmem:[#allocation8 + $0x300] ss:$16 sps:$4 sm:$0xff]  }
 0x11e   :  { %v261_v1 = vpack.c.bf16 %v260_v62, %v260_v62  ;;  %v1912_v62 = vld [vmem:[#allocation8 + $0xec] ss:$16 sps:$4 sm:$0xff]  }
 0x120   :  { %509 = vmatmul.mubr.bf16.vlgmr.msra.gmra.mxu1 %v261_v1  ;;  %550 = vmatmul.mubr.bf16.vlgmr.msra.gmra.mxu0 %v261_v1 }
 0x121   :  { %1357 = vmatpush1.bf16.msra.mxu1 %v1814_v63  ;;  %1398 = vmatpush1.bf16.msra.mxu0 %v1817_v0  ;;  %v1915_v63 = vld [vmem:[#allocation8 + $0x2ec] ss:$16 sps:$4 sm:$0xff]   ;;  %v296_v0 = vlaneseq }
 0x122   :  { %1358 = vmatprep.subr.bf16.mxu1 %v1822_v2  ;;  %1399 = vmatprep.subr.bf16.mxu0 %v1825_v3 }
 0x123   :  { %v2179_v1 = vshrl.u32 %v296_v0, 7  ;;  %v1961_v0 = vld [vmem:[#allocation8 + $0x3e8] ss:$16 sps:$4 sm:$0xff]  }
 0x125   :  { %1359 = vmatpush1.bf16.msra.mxu1 %v1820_v4  ;;  %1400 = vmatpush1.bf16.msra.mxu0 %v1823_v5  ;;  %v298_v2 = vsub.s32 0, %v2179_v1  ;;  %v306_v3 = vsub.s32 2, %v2179_v1  ;;  %v294_v4 = vld [vmem:[%s2222_s4] sm:$0xf]  ;;  %v302_v5 = vsub.s32 1, %v2179_v1 }
 0x126   :  { %1360 = vmatprep.subr.bf16.mxu1 %v1828_v6  ;;  %1401 = vmatprep.subr.bf16.mxu0 %v1831_v7  ;;  %v310_v6 = vsub.s32 3, %v2179_v1 }
 0x127   :  { %v299_v7 = vrot.slane %v294_v4, %v298_v2 }
 0x129   :  { %1361 = vmatpush1.bf16.msra.mxu1 %v1826_v8  ;;  %1402 = vmatpush1.bf16.msra.mxu0 %v1829_v9  ;;  %v307_v8 = vrot.slane %v294_v4, %v306_v3  ;;  %v303_v9 = vrot.slane %v294_v4, %v302_v5 }
 0x12a   :  { %1362 = vmatprep.subr.bf16.mxu1 %v1834_v10  ;;  %1403 = vmatprep.subr.bf16.mxu0 %v1837_v11  ;;  %v311_v10 = vrot.slane %v294_v4, %v310_v6  ;;  %v1966_v4 = vld [vmem:[#allocation8 + $0x1cc] ss:$16 sps:$4 sm:$0xff]  }
 0x12d   :  { %1363 = vmatpush1.bf16.msra.mxu1 %v1832_v12  ;;  %1404 = vmatpush1.bf16.msra.mxu0 %v1835_v13 }
 0x12e   :  { %1364 = vmatprep.subr.bf16.mxu1 %v1840_v14  ;;  %1405 = vmatprep.subr.bf16.mxu0 %v1843_v15 }
 0x131   :  { %1365 = vmatpush1.bf16.msra.mxu1 %v1838_v16  ;;  %1406 = vmatpush1.bf16.msra.mxu0 %v1841_v17 }
 0x132   :  { %1366 = vmatprep.subr.bf16.mxu1 %v1846_v18  ;;  %1407 = vmatprep.subr.bf16.mxu0 %v1849_v19 }
 0x135   :  { %1367 = vmatpush1.bf16.msra.mxu1 %v1844_v20  ;;  %1408 = vmatpush1.bf16.msra.mxu0 %v1847_v21 }
 0x136   :  { %1368 = vmatprep.subr.bf16.mxu1 %v1852_v22  ;;  %1409 = vmatprep.subr.bf16.mxu0 %v1855_v23 }
 0x139   :  { %1369 = vmatpush1.bf16.msra.mxu1 %v1850_v24  ;;  %1410 = vmatpush1.bf16.msra.mxu0 %v1853_v25 }
 0x13a   :  { %1370 = vmatprep.subr.bf16.mxu1 %v1858_v26  ;;  %1411 = vmatprep.subr.bf16.mxu0 %v1861_v27 }
 0x13d   :  { %1371 = vmatpush1.bf16.msra.mxu1 %v1856_v28  ;;  %1412 = vmatpush1.bf16.msra.mxu0 %v1859_v29  ;;  %v1910_v29 = vld [vmem:[#allocation8 + $0xe8] ss:$16 sps:$4 sm:$0xff]  }
 0x13e   :  { %1372 = vmatprep.subr.bf16.mxu1 %v1864_v30  ;;  %1413 = vmatprep.subr.bf16.mxu0 %v1867_v31  ;;  %v1913_v30 = vld [vmem:[#allocation8 + $0x2e8] ss:$16 sps:$4 sm:$0xff]  }
 0x141   :  { %1373 = vmatpush2.bf16.msra.mxu1 %v1862_v32  ;;  %1414 = vmatpush2.bf16.msra.mxu0 %v1865_v33  ;;  %v1918_v33 = vld [vmem:[#allocation8 + $0xcc] ss:$16 sps:$4 sm:$0xff]  }
 0x142   :  { %1374 = vmatprep.subr.bf16.mxu1 %v1870_v34  ;;  %1415 = vmatprep.subr.bf16.mxu0 %v1873_v35  ;;  %v1921_v34 = vld [vmem:[#allocation8 + $0x2cc] ss:$16 sps:$4 sm:$0xff]   ;;  %v1916_v35 = vld [vmem:[#allocation8 + $0xc8] ss:$16 sps:$4 sm:$0xff]  }
 0x145   :  { %1375 = vmatpush2.bf16.msra.mxu1 %v1868_v36  ;;  %1416 = vmatpush2.bf16.msra.mxu0 %v1871_v37  ;;  %v1919_v36 = vld [vmem:[#allocation8 + $0x2c8] ss:$16 sps:$4 sm:$0xff]   ;;  %v1924_v37 = vld [vmem:[#allocation8 + $0xac] ss:$16 sps:$4 sm:$0xff]  }
 0x146   :  { %1376 = vmatprep.subr.bf16.mxu1 %v1876_v38  ;;  %1417 = vmatprep.subr.bf16.mxu0 %v1879_v39  ;;  %v1927_v38 = vld [vmem:[#allocation8 + $0x2ac] ss:$16 sps:$4 sm:$0xff]   ;;  %v1922_v39 = vld [vmem:[#allocation8 + $0xa8] ss:$16 sps:$4 sm:$0xff]  }
 0x149   :  { %1377 = vmatpush2.bf16.msra.mxu1 %v1874_v40  ;;  %1418 = vmatpush2.bf16.msra.mxu0 %v1877_v41  ;;  %v1925_v40 = vld [vmem:[#allocation8 + $0x2a8] ss:$16 sps:$4 sm:$0xff]   ;;  %v1930_v41 = vld [vmem:[#allocation8 + $0x8c] ss:$16 sps:$4 sm:$0xff]  }
 0x14a   :  { %1378 = vmatprep.subr.bf16.mxu1 %v1882_v42  ;;  %1419 = vmatprep.subr.bf16.mxu0 %v1885_v43  ;;  %v1933_v42 = vld [vmem:[#allocation8 + $0x28c] ss:$16 sps:$4 sm:$0xff]   ;;  %v1928_v43 = vld [vmem:[#allocation8 + $0x88] ss:$16 sps:$4 sm:$0xff]  }
 0x14d   :  { %1379 = vmatpush2.bf16.msra.mxu1 %v1880_v44  ;;  %1420 = vmatpush2.bf16.msra.mxu0 %v1883_v45  ;;  %v1931_v44 = vld [vmem:[#allocation8 + $0x288] ss:$16 sps:$4 sm:$0xff]   ;;  %v1936_v45 = vld [vmem:[#allocation8 + $0x6c] ss:$16 sps:$4 sm:$0xff]  }
 0x14e   :  { %1380 = vmatprep.subr.bf16.mxu1 %v1888_v46  ;;  %1421 = vmatprep.subr.bf16.mxu0 %v1891_v47  ;;  %v1939_v46 = vld [vmem:[#allocation8 + $0x26c] ss:$16 sps:$4 sm:$0xff]   ;;  %v1934_v47 = vld [vmem:[#allocation8 + $0x68] ss:$16 sps:$4 sm:$0xff]  }
 0x151   :  { %1381 = vmatpush2.bf16.msra.mxu1 %v1886_v48  ;;  %1422 = vmatpush2.bf16.msra.mxu0 %v1889_v49  ;;  %v1937_v48 = vld [vmem:[#allocation8 + $0x268] ss:$16 sps:$4 sm:$0xff]   ;;  %v1942_v49 = vld [vmem:[#allocation8 + $0x4c] ss:$16 sps:$4 sm:$0xff]  }
 0x152   :  { %1382 = vmatprep.subr.bf16.mxu1 %v1894_v50  ;;  %1423 = vmatprep.subr.bf16.mxu0 %v1897_v51  ;;  %v1945_v50 = vld [vmem:[#allocation8 + $0x24c] ss:$16 sps:$4 sm:$0xff]   ;;  %v1940_v51 = vld [vmem:[#allocation8 + $0x48] ss:$16 sps:$4 sm:$0xff]  }
 0x155   :  { %1383 = vmatpush2.bf16.msra.mxu1 %v1892_v52  ;;  %1424 = vmatpush2.bf16.msra.mxu0 %v1895_v53  ;;  %v1943_v52 = vld [vmem:[#allocation8 + $0x248] ss:$16 sps:$4 sm:$0xff]   ;;  %v1948_v53 = vld [vmem:[#allocation8 + $0x2c] ss:$16 sps:$4 sm:$0xff]  }
 0x156   :  { %1384 = vmatprep.subr.bf16.mxu1 %v1900_v54  ;;  %1425 = vmatprep.subr.bf16.mxu0 %v1903_v55  ;;  %v1951_v54 = vld [vmem:[#allocation8 + $0x22c] ss:$16 sps:$4 sm:$0xff]   ;;  %v1946_v55 = vld [vmem:[#allocation8 + $0x28] ss:$16 sps:$4 sm:$0xff]  }
 0x159   :  { %1385 = vmatpush2.bf16.msra.mxu1 %v1898_v56  ;;  %1426 = vmatpush2.bf16.msra.mxu0 %v1901_v57  ;;  %v1949_v56 = vld [vmem:[#allocation8 + $0x228] ss:$16 sps:$4 sm:$0xff]   ;;  %v1954_v57 = vld [vmem:[#allocation8 + $0xc] ss:$16 sps:$4 sm:$0xff]  }
 0x15a   :  { %1386 = vmatprep.subr.bf16.mxu1 %v1906_v58  ;;  %1427 = vmatprep.subr.bf16.mxu0 %v1909_v59  ;;  %v1957_v58 = vld [vmem:[#allocation8 + $0x20c] ss:$16 sps:$4 sm:$0xff]   ;;  %v1952_v59 = vld [vmem:[#allocation8 + $0x8] ss:$16 sps:$4 sm:$0xff]  }
 0x15d   :  { %1387 = vmatpush2.bf16.msra.mxu1 %v1904_v60  ;;  %1428 = vmatpush2.bf16.msra.mxu0 %v1907_v61  ;;  %v1955_v60 = vld [vmem:[#allocation8 + $0x208] ss:$16 sps:$4 sm:$0xff]   ;;  %v1960_v61 = vld [vmem:[#allocation8 + $0x1ec] ss:$16 sps:$4 sm:$0xff]  }
 0x15e   :  { %1438 = vmatprep.subr.bf16.mxu1 %v1912_v62  ;;  %1479 = vmatprep.subr.bf16.mxu0 %v1915_v63  ;;  %v1963_v62 = vld [vmem:[#allocation8 + $0x3ec] ss:$16 sps:$4 sm:$0xff]   ;;  %v1958_v63 = vld [vmem:[#allocation8 + $0x1e8] ss:$16 sps:$4 sm:$0xff]  }
 0x1e0   :  { %v510_v11 = vpop.f32.mrf.mxu1  ;;  %v551_v12 = vpop.f32.mrf.mxu0 }
 0x1e1   :  { %v511_v13 = vadd.f32 %v510_v11, %v299_v7  ;;  %v552_v14 = vadd.f32 %v551_v12, %v307_v8  ;;  %v1969_v7 = vld [vmem:[#allocation8 + $0x3cc] ss:$16 sps:$4 sm:$0xff]   ;;  %v1964_v8 = vld [vmem:[#allocation8 + $0x1c8] ss:$16 sps:$4 sm:$0xff]  }
 0x1e2   :  { %v512_v15 = vpop.f32.mrf.mxu1  ;;  %v553_v16 = vpop.f32.mrf.mxu0  ;;  %v1975_v11 = vld [vmem:[#allocation8 + $0x3ac] ss:$16 sps:$4 sm:$0xff]   ;;  %v1970_v12 = vld [vmem:[#allocation8 + $0x1a8] ss:$16 sps:$4 sm:$0xff]  }
 0x1e3   :  { %v513_v17 = vadd.f32 %v512_v15, %v303_v9  ;;  %v554_v18 = vadd.f32 %v553_v16, %v311_v10  ;;  %v558_v19 = vmax.f32 %v511_v13, 0.0  ;;  %v560_v20 = vmax.f32 %v552_v14, 0.0  ;;  %v1967_v9 = vld [vmem:[#allocation8 + $0x3c8] ss:$16 sps:$4 sm:$0xff]   ;;  %v1972_v10 = vld [vmem:[#allocation8 + $0x1ac] ss:$16 sps:$4 sm:$0xff]  }
 0x1e4   :  { %v514_v21 = vpop.f32.mrf.mxu1  ;;  %v555_v22 = vpop.f32.mrf.mxu0  ;;  %v1973_v13 = vld [vmem:[#allocation8 + $0x3a8] ss:$16 sps:$4 sm:$0xff]   ;;  %v1978_v14 = vld [vmem:[#allocation8 + $0x18c] ss:$16 sps:$4 sm:$0xff]  }
 0x1e5   :  { %v559_v23 = vmax.f32 %v513_v17, 0.0  ;;  %v561_v24 = vmax.f32 %v554_v18, 0.0  ;;  %v2196_v31 = vpack.c.bf16 %v558_v19, %v558_v19  ;;  %v2198_v32 = vpack.c.bf16 %v560_v20, %v560_v20  ;;  %v1981_v15 = vld [vmem:[#allocation8 + $0x38c] ss:$16 sps:$4 sm:$0xff]   ;;  %v1976_v16 = vld [vmem:[#allocation8 + $0x188] ss:$16 sps:$4 sm:$0xff]  }
 0x1e6   :  { %v515_v25 = vpop.f32.mrf.mxu1  ;;  %v556_v26 = vpop.f32.mrf.mxu0  ;;  %v1979_v17 = vld [vmem:[#allocation8 + $0x388] ss:$16 sps:$4 sm:$0xff]   ;;  %v1984_v18 = vld [vmem:[#allocation8 + $0x16c] ss:$16 sps:$4 sm:$0xff]  }
 0x1e7   :  { %v563_v27 = vpack.c.bf16 %v559_v23, %v559_v23  ;;  %v565_v28 = vpack.c.bf16 %v561_v24, %v561_v24  ;;  %v1987_v19 = vld [vmem:[#allocation8 + $0x36c] ss:$16 sps:$4 sm:$0xff]   ;;  %v1982_v20 = vld [vmem:[#allocation8 + $0x168] ss:$16 sps:$4 sm:$0xff]  }
 0x1e8   :  { %v1985_v21 = vld [vmem:[#allocation8 + $0x368] ss:$16 sps:$4 sm:$0xff]   ;;  %v1990_v22 = vld [vmem:[#allocation8 + $0x14c] ss:$16 sps:$4 sm:$0xff]  }
 0x1e9   :  { %1388 = vmatprep.mubr.bf16.mxu1 %v563_v27  ;;  %1429 = vmatprep.mubr.bf16.mxu0 %v565_v28  ;;  %v1993_v23 = vld [vmem:[#allocation8 + $0x34c] ss:$16 sps:$4 sm:$0xff]   ;;  %v1988_v24 = vld [vmem:[#allocation8 + $0x148] ss:$16 sps:$4 sm:$0xff]  }
 0x1ea   :  { %1389 = vmatmul.mubr.bf16.vlgmr.msra.gmra.mxu1 %v2196_v31  ;;  %1430 = vmatmul.mubr.bf16.vlgmr.msra.gmra.mxu0 %v2198_v32  ;;  %v1991_v25 = vld [vmem:[#allocation8 + $0x348] ss:$16 sps:$4 sm:$0xff]   ;;  %v1996_v26 = vld [vmem:[#allocation8 + $0x12c] ss:$16 sps:$4 sm:$0xff]  }
 0x1eb   :  { %1439 = vmatpush1.bf16.msra.mxu1 %v1910_v29  ;;  %1480 = vmatpush1.bf16.msra.mxu0 %v1913_v30  ;;  %v1997_v29 = vld [vmem:[#allocation8 + $0x328] ss:$16 sps:$4 sm:$0xff]   ;;  %v2002_v30 = vld [vmem:[#allocation8 + $0x10c] ss:$16 sps:$4 sm:$0xff]  }
 0x1ec   :  { %1470 = vmatprep.mubr.bf16.mxu1 %v563_v27  ;;  %1511 = vmatprep.mubr.bf16.mxu0 %v565_v28  ;;  %v1999_v27 = vld [vmem:[#allocation8 + $0x32c] ss:$16 sps:$4 sm:$0xff]   ;;  %v1994_v28 = vld [vmem:[#allocation8 + $0x128] ss:$16 sps:$4 sm:$0xff]  }
 0x1ed   :  { %1440 = vmatprep.subr.bf16.mxu1 %v1918_v33  ;;  %1481 = vmatprep.subr.bf16.mxu0 %v1921_v34  ;;  %v2005_v33 = vld [vmem:[#allocation8 + $0x30c] ss:$16 sps:$4 sm:$0xff]   ;;  %v2000_v34 = vld [vmem:[#allocation8 + $0x108] ss:$16 sps:$4 sm:$0xff]  }
 0x1ef   :  { %1441 = vmatpush1.bf16.msra.mxu1 %v1916_v35  ;;  %1482 = vmatpush1.bf16.msra.mxu0 %v1919_v36  ;;  %v2003_v35 = vld [vmem:[#allocation8 + $0x308] ss:$16 sps:$4 sm:$0xff]   ;;  %v694_v36 = vld [vmem:[%s2224_s6] sm:$0xf]  ;;  %s2123_s6 = smov [#allocation10]  }
 0x1f0   :  { %1442 = vmatprep.subr.bf16.mxu1 %v1924_v37  ;;  %1483 = vmatprep.subr.bf16.mxu0 %v1927_v38  ;;  %v699_v37 = vrot.slane %v694_v36, %v298_v2  ;;  %v703_v38 = vrot.slane %v694_v36, %v302_v5  ;;  %v707_v2 = vrot.slane %v694_v36, %v306_v3  ;;  %s1530_s25 = sshll.u32 %s2123_s6, 4  ;;  %s1531_s25 = int_to_ptr.vmem [resolvable:$true] %s1530_s25 }
 0x1f1   :  { %v711_v5 = vrot.slane %v694_v36, %v310_v6  ;;  %s2086_s26 = scalar_lea.vmem %s1531_s25, 512  ;;  %p2091_p7 = scmp.lt.s32.totalorder %s1531_s25, %s1531_s25 }
 0x1f2   :  { %p2087_p6 = scmp.ne.s32.totalorder %s1531_s25, %s2086_s26  ;;  %p2092_p8 = scmp.lt.s32.totalorder %s2086_s26, %s2086_s26 }
 0x1f3   :  { %1443 = vmatpush1.bf16.msra.mxu1 %v1922_v39  ;;  %1484 = vmatpush1.bf16.msra.mxu0 %v1925_v40 }
 0x1f4   :  { %1444 = vmatprep.subr.bf16.mxu1 %v1930_v41  ;;  %1485 = vmatprep.subr.bf16.mxu0 %v1933_v42  ;;  %p2093_p9 = por %p2092_p8, %p2091_p7 }
 0x1f6   :  { %p2094_p10 = pnand %p2093_p9, %p2087_p6 }
 0x1f7   :  { %1445 = vmatpush1.bf16.msra.mxu1 %v1928_v43  ;;  %1486 = vmatpush1.bf16.msra.mxu0 %v1931_v44 }
 0x1f8   :  { %1446 = vmatprep.subr.bf16.mxu1 %v1936_v45  ;;  %1487 = vmatprep.subr.bf16.mxu0 %v1939_v46 }
 0x1fb   :  { %1447 = vmatpush1.bf16.msra.mxu1 %v1934_v47  ;;  %1488 = vmatpush1.bf16.msra.mxu0 %v1937_v48 }
 0x1fc   :  { %1448 = vmatprep.subr.bf16.mxu1 %v1942_v49  ;;  %1489 = vmatprep.subr.bf16.mxu0 %v1945_v50 }
 0x1ff   :  { %1449 = vmatpush1.bf16.msra.mxu1 %v1940_v51  ;;  %1490 = vmatpush1.bf16.msra.mxu0 %v1943_v52 }
 0x200   :  { %1450 = vmatprep.subr.bf16.mxu1 %v1948_v53  ;;  %1491 = vmatprep.subr.bf16.mxu0 %v1951_v54 }
 0x203   :  { %1451 = vmatpush1.bf16.msra.mxu1 %v1946_v55  ;;  %1492 = vmatpush1.bf16.msra.mxu0 %v1949_v56 }
 0x204   :  { %1452 = vmatprep.subr.bf16.mxu1 %v1954_v57  ;;  %1493 = vmatprep.subr.bf16.mxu0 %v1957_v58 }
 0x207   :  { %1453 = vmatpush1.bf16.msra.mxu1 %v1952_v59  ;;  %1494 = vmatpush1.bf16.msra.mxu0 %v1955_v60 }
 0x208   :  { %1454 = vmatprep.subr.bf16.mxu1 %v1960_v61  ;;  %1495 = vmatprep.subr.bf16.mxu0 %v1963_v62 }
 0x20b   :  { %1455 = vmatpush2.bf16.msra.mxu1 %v1958_v63  ;;  %1496 = vmatpush2.bf16.msra.mxu0 %v1961_v0 }
 0x20c   :  { %1456 = vmatprep.subr.bf16.mxu1 %v1966_v4  ;;  %1497 = vmatprep.subr.bf16.mxu0 %v1969_v7 }
 0x20f   :  { %1457 = vmatpush2.bf16.msra.mxu1 %v1964_v8  ;;  %1498 = vmatpush2.bf16.msra.mxu0 %v1967_v9 }
 0x210   :  { %1458 = vmatprep.subr.bf16.mxu1 %v1972_v10  ;;  %1499 = vmatprep.subr.bf16.mxu0 %v1975_v11 }
 0x213   :  { %1459 = vmatpush2.bf16.msra.mxu1 %v1970_v12  ;;  %1500 = vmatpush2.bf16.msra.mxu0 %v1973_v13 }
 0x214   :  { %1460 = vmatprep.subr.bf16.mxu1 %v1978_v14  ;;  %1501 = vmatprep.subr.bf16.mxu0 %v1981_v15 }
 0x217   :  { %1461 = vmatpush2.bf16.msra.mxu1 %v1976_v16  ;;  %1502 = vmatpush2.bf16.msra.mxu0 %v1979_v17 }
 0x218   :  { %1462 = vmatprep.subr.bf16.mxu1 %v1984_v18  ;;  %1503 = vmatprep.subr.bf16.mxu0 %v1987_v19 }
 0x21b   :  { %1463 = vmatpush2.bf16.msra.mxu1 %v1982_v20  ;;  %1504 = vmatpush2.bf16.msra.mxu0 %v1985_v21 }
 0x21c   :  { %1464 = vmatprep.subr.bf16.mxu1 %v1990_v22  ;;  %1505 = vmatprep.subr.bf16.mxu0 %v1993_v23 }
 0x21f   :  { %1465 = vmatpush2.bf16.msra.mxu1 %v1988_v24  ;;  %1506 = vmatpush2.bf16.msra.mxu0 %v1991_v25 }
 0x220   :  { %1466 = vmatprep.subr.bf16.mxu1 %v1996_v26  ;;  %1507 = vmatprep.subr.bf16.mxu0 %v1999_v27 }
 0x223   :  { %1467 = vmatpush2.bf16.msra.mxu1 %v1994_v28  ;;  %1508 = vmatpush2.bf16.msra.mxu0 %v1997_v29 }
 0x224   :  { %1468 = vmatprep.subr.bf16.mxu1 %v2002_v30  ;;  %1509 = vmatprep.subr.bf16.mxu0 %v2005_v33 }
 0x227   :  { %1469 = vmatpush2.bf16.msra.mxu1 %v2000_v34  ;;  %1510 = vmatpush2.bf16.msra.mxu0 %v2003_v35 }
 0x22a   :  { %1471 = vmatmul.mubr.bf16.vlgmr.msra.gmra.mxu1 %v2196_v31  ;;  %1512 = vmatmul.mubr.bf16.vlgmr.msra.gmra.mxu0 %v2198_v32 }
 0x2aa   :  { %v1390_v39 = vpop.f32.mrf.mxu1  ;;  %v1431_v40 = vpop.f32.mrf.mxu0 }
 0x2ab   :  { %v1391_v41 = vadd.f32 %v1390_v39, %v699_v37 }
 0x2ac   :  { %v1392_v42 = vpop.f32.mrf.mxu1  ;;  %v1433_v43 = vpop.f32.mrf.mxu0 }
 0x2ad   :  { %v1432_v44 = vadd.f32 %v1431_v40, %v1391_v41  ;;  %v1393_v45 = vadd.f32 %v1392_v42, %v703_v38 }
 0x2ae   :  { %v1394_v31 = vpop.f32.mrf.mxu1  ;;  %v1435_v46 = vpop.f32.mrf.mxu0 }
 0x2af   :  { %1520 = vst [vmem:[#allocation10] sm:$0xff] %v1432_v44  ;;  %v1434_v32 = vadd.f32 %v1433_v43, %v1393_v45 }
 0x2b0   :  { %v1395_v47 = vpop.f32.mrf.mxu1  ;;  %v1436_v48 = vpop.f32.mrf.mxu0 }
 0x2b1   :  { %1521 = vst [vmem:[#allocation10 + $0x8] sm:$0xff] %v1434_v32 }
 0x2ea   :  { %v1472_v49 = vpop.f32.mrf.mxu1  ;;  %v1513_v50 = vpop.f32.mrf.mxu0 }
 0x2eb   :  { %v1473_v51 = vadd.f32 %v1472_v49, %v707_v2 }
 0x2ec   :  { %v1474_v52 = vpop.f32.mrf.mxu1  ;;  %v1515_v53 = vpop.f32.mrf.mxu0 }
 0x2ed   :  { %v1514_v54 = vadd.f32 %v1513_v50, %v1473_v51  ;;  %v1475_v55 = vadd.f32 %v1474_v52, %v711_v5 }
 0x2ee   :  { %v1476_v56 = vpop.f32.mrf.mxu1  ;;  %v1517_v57 = vpop.f32.mrf.mxu0 }
 0x2ef   :  { %1522 = vst [vmem:[#allocation10 + $0x10] sm:$0xff] %v1514_v54  ;;  %v1516_v58 = vadd.f32 %v1515_v53, %v1475_v55 }
 0x2f0   :  { %v1477_v59 = vpop.f32.mrf.mxu1  ;;  %v1518_v60 = vpop.f32.mrf.mxu0 }
 0x2f1   :  { %1523 = vst [vmem:[#allocation10 + $0x18] sm:$0xff] %v1516_v58 }
 0x2f2   :  { %2097 = shalt.err (!%p2094_p10)
}
 0x2f3   :  { %1533 = dma.vmem_to_hbm [thread:$0]  %s1531_s25, 512, %s2225_s7, [#allocation4]  }
 0x2f4   :  { %2112 = dma.done.wait [#allocation4], 512  }
 0x2f5   :  { %2113 = vsyncadd [#allocation4], 4294966784 }
 0x2f6   :  { %1537 = vsyncpa [#allocation3], 1 }
 0x2f7   :  { %1538 = vsyncpa [#allocation6], 1 }
 0x2f8   :  { %1539 = vsyncpa [#allocation9], 1 }
 0x2f9   :  { %1540 = vsyncpa [#allocation4], 1 }

</bundles_post_ra>
